<compile_context>
chip_gen: v7x
topology: tpu7x:2x2x1
jax: 0.10.0
libtpu: 0.0.40
codegen_flags: <defaults>
</compile_context>

<pallas_src>
import jax
import jax.numpy as jnp
from jax import lax
from jax.experimental import pallas as pl
from jax.experimental.pallas import tpu as pltpu


def _round_up(x, m):
    return (x + m - 1) // m * m


def _disc_kernel(h_pl_ref, h_mi_ref, v_ref, b_ref, out_ref, acc_ref):
    # h_pl_ref, h_mi_ref: (tile_n, tile_k) VMEM tiles, native dtype (f32/bf16)
    # v_ref  : (tile_k, 1) VMEM, v = W[0] @ c chunk (same dtype as h)
    # b_ref  : (1,)        SMEM scalar bias (f32)
    # out_ref: (tile_n, 2) VMEM logits block, already in PyTorch (N, 2) layout
    # acc_ref: (tile_n, 2) VMEM f32 accumulator over feature (K) chunks
    k = pl.program_id(1)

    @pl.when(k == 0)
    def _init():
        acc_ref[...] = jnp.zeros_like(acc_ref)

    v = v_ref[...]                                               # (tile_k, 1)
    # Natural (m,k) x (k,n) MXU orientation; f32 accumulation on the MXU.
    sc1 = jnp.dot(h_pl_ref[...], v, preferred_element_type=jnp.float32)
    sc2 = jnp.dot(h_mi_ref[...], v, preferred_element_type=jnp.float32)
    acc_ref[:, 0:1] += sc1
    acc_ref[:, 1:2] += sc2

    @pl.when(k == pl.num_programs(1) - 1)
    def _finalize():
        out_ref[...] = (acc_ref[...] + b_ref[0]).astype(out_ref.dtype)


def _choose_tiles(N, n_h, itemsize):
    """Pick (tile_n, tile_k, vmem_footprint) per the VMEM/overhead budget."""
    # Feature (K) chunking only when rows are huge and cleanly lane-divisible;
    # otherwise the full n_h is a single block (bypasses the 128 constraint).
    tile_k = n_h
    if n_h > 2048 and n_h % 128 == 0:
        for cand in (2048, 1024, 512, 256, 128):
            if n_h % cand == 0:
                tile_k = cand
                break

    # Row tiling: target ~2 MiB of h-data per input tile per grid step so the
    # per-step DMA comfortably exceeds the ~0.35 us grid-step overhead.
    target = 2 << 20
    tile_n = max(512, target // (tile_k * itemsize))
    tile_n = min(_round_up(tile_n, 128), 4096)

    def footprint(tn):
        return (4 * tn * tile_k * itemsize        # 2 inputs x 2 pipeline bufs
                + 3 * tn * 128 * 4                # out (2 bufs) + acc, lane-padded
                + 2 * tile_k * 128 * itemsize)    # v (2 bufs), lane-padded

    budget = 24 << 20                             # fits v7x (64 MiB VMEM) too
    while tile_n > 128 and footprint(tile_n) > budget:
        tile_n //= 2

    # Never make the row tile larger than the (8-aligned) row count.
    tile_n = max(8, min(tile_n, _round_up(N, 8)))
    tile_n = _round_up(tile_n, 8)                 # sublane constraint
    return tile_n, tile_k, footprint(tile_n)


def discriminator_forward(c, h_pl, h_mi, weight, bias,
                          s_bias1=None, s_bias2=None,
                          *, small_threshold=1 << 16, force_pallas=False):
    """c: (1, n_h); h_pl, h_mi: (N, n_h); weight: (1, n_h, n_h); bias: (1,)."""
    N, n_h = h_pl.shape
    h_mi = h_mi.astype(h_pl.dtype)
    c_vec = jnp.asarray(c).reshape(-1).astype(jnp.float32)        # (n_h,)

    # v = W[0] @ c : one tiny (n_h, n_h) x (n_h,) matvec, full precision.
    w0 = weight[0].astype(jnp.float32)
    v32 = jnp.einsum("ij,j->i", w0, c_vec,
                     precision=lax.Precision.HIGHEST)             # (n_h,)
    b32 = jnp.asarray(bias).reshape(-1)[:1].astype(jnp.float32)   # (1,)

    if (N * n_h < small_threshold) and not force_pallas:
        # Tiny problems are dominated by launch/per-step overhead: fused XLA op.
        sc1 = h_pl.astype(jnp.float32) @ v32[:, None] + b32[0]
        sc2 = h_mi.astype(jnp.float32) @ v32[:, None] + b32[0]
        logits = jnp.concatenate([sc1, sc2], axis=1)
    else:
        itemsize = jnp.dtype(h_pl.dtype).itemsize
        tile_n, tile_k, vmem_est = _choose_tiles(N, n_h, itemsize)
        grid = (pl.cdiv(N, tile_n), n_h // tile_k)
        v_in = v32.astype(h_pl.dtype)[:, None]                    # (n_h, 1) native

        cost = pl.CostEstimate(
            flops=4 * N * n_h,
            transcendentals=0,
            bytes_accessed=2 * N * n_h * itemsize + n_h * itemsize + N * 2 * 4,
        )
        vmem_limit = int(min(56 << 20, max(32 << 20, 2 * vmem_est)))

        logits = pl.pallas_call(
            _disc_kernel,
            out_shape=jax.ShapeDtypeStruct((N, 2), jnp.float32),
            grid=grid,
            in_specs=[
                pl.BlockSpec((tile_n, tile_k), lambda i, k: (i, k)),   # h_pl
                pl.BlockSpec((tile_n, tile_k), lambda i, k: (i, k)),   # h_mi
                pl.BlockSpec((tile_k, 1), lambda i, k: (k, 0)),        # v chunk
                pl.BlockSpec(memory_space=pltpu.MemorySpace.SMEM),     # bias
            ],
            out_specs=pl.BlockSpec((tile_n, 2), lambda i, k: (i, 0)),
            scratch_shapes=[pltpu.VMEM((tile_n, 2), jnp.float32)],
            compiler_params=pltpu.CompilerParams(
                dimension_semantics=("parallel", "arbitrary"),
                vmem_limit_bytes=vmem_limit),
            cost_estimate=cost,
        )(h_pl, h_mi, v_in, b32)

    # Optional score biases (added to sc_1 / sc_2 before concat semantics).
    if s_bias1 is not None:
        logits = logits.at[:, 0:1].add(jnp.asarray(s_bias1, jnp.float32))
    if s_bias2 is not None:
        logits = logits.at[:, 1:2].add(jnp.asarray(s_bias2, jnp.float32))
    return logits


def init_params(key, n_h):
    """Mirror the module init: xavier_uniform_ weight, zero bias."""
    fan_in = n_h * n_h      # PyTorch fan computation on (1, n_h, n_h)
    fan_out = 1 * n_h
    bound = (6.0 / (fan_in + fan_out)) ** 0.5
    weight = jax.random.uniform(key, (1, n_h, n_h), jnp.float32, -bound, bound)
    bias = jnp.zeros((1,), jnp.float32)
    return weight, bias


def _reference(c, h_pl, h_mi, weight, bias):
    # Pure-JAX reference of nn.Bilinear with out_features=1.
    c_x = jnp.broadcast_to(c, h_pl.shape)
    w0 = weight[0]
    sc1 = jnp.einsum("ni,ij,nj->n", h_pl, w0, c_x,
                     precision=lax.Precision.HIGHEST)[:, None] + bias[0]
    sc2 = jnp.einsum("ni,ij,nj->n", h_mi, w0, c_x,
                     precision=lax.Precision.HIGHEST)[:, None] + bias[0]
    return jnp.concatenate([sc1, sc2], axis=1)


if __name__ == "__main__":
    key = jax.random.PRNGKey(0)
    k_w, k_c, k_p, k_m = jax.random.split(key, 4)

    # 1) Small shapes consistent with the module, forced through the kernel.
    N, n_h = 8, 32
    weight, bias = init_params(k_w, n_h)
    c = jax.random.normal(k_c, (1, n_h), jnp.float32)
    h_pl = jax.random.normal(k_p, (N, n_h), jnp.float32)
    h_mi = jax.random.normal(k_m, (N, n_h), jnp.float32)
    out = jax.block_until_ready(
        discriminator_forward(c, h_pl, h_mi, weight, bias, force_pallas=True))
    ref = _reference(c, h_pl, h_mi, weight, bias)
    assert out.shape == (N, 2)
    assert jnp.allclose(out, ref, atol=1e-2, rtol=1e-2)

    # 2) Small-problem fallback path (no pallas_call).
    out_fb = jax.block_until_ready(discriminator_forward(c, h_pl, h_mi, weight, bias))
    assert jnp.allclose(out_fb, ref, atol=1e-2, rtol=1e-2)

    # 3) Multi-row-tile path with a partial edge block (no wrapper padding).
    N2, n_h2 = 6000, 128
    w2, b2 = init_params(k_w, n_h2)
    c2 = jax.random.normal(k_c, (1, n_h2), jnp.float32)
    hp2 = jax.random.normal(k_p, (N2, n_h2), jnp.float32)
    hm2 = jax.random.normal(k_m, (N2, n_h2), jnp.float32)
    out2 = jax.block_until_ready(discriminator_forward(c2, hp2, hm2, w2, b2))
    ref2 = _reference(c2, hp2, hm2, w2, b2)
    assert out2.shape == (N2, 2)
    assert jnp.allclose(out2, ref2, atol=1e-2, rtol=1e-2)

    # 4) bf16 streaming + feature (K) chunking with the f32 accumulator.
    N3, n_h3 = 300, 2560
    w3, b3 = init_params(k_w, n_h3)
    c3 = jax.random.normal(k_c, (1, n_h3), jnp.float32)
    hp3 = jax.random.normal(k_p, (N3, n_h3), jnp.float32).astype(jnp.bfloat16)
    hm3 = jax.random.normal(k_m, (N3, n_h3), jnp.float32).astype(jnp.bfloat16)
    out3 = jax.block_until_ready(discriminator_forward(c3, hp3, hm3, w3, b3))
    ref3 = _reference(c3, hp3.astype(jnp.float32), hm3.astype(jnp.float32), w3, b3)
    assert out3.shape == (N3, 2)
    assert jnp.allclose(out3, ref3, atol=1.5e-1, rtol=5e-2)

    print("KERNEL_OK")
</pallas_src>

<mosaic_0001>
module attributes {stable_mosaic.version = 11 : i64} {
  func.func @_disc_kernel(%arg0: i32, %arg1: i32, %arg2: memref<8x32xf32, #tpu.memory_space<vmem>>, %arg3: memref<8x32xf32, #tpu.memory_space<vmem>>, %arg4: memref<32x1xf32, #tpu.memory_space<vmem>>, %arg5: memref<1xf32, #tpu.memory_space<smem>>, %arg6: memref<8x2xf32, #tpu.memory_space<vmem>>, %arg7: memref<8x2xf32, #tpu.memory_space<vmem>>) attributes {dimension_semantics = [#tpu.dimension_semantics<parallel>, #tpu.dimension_semantics<arbitrary>], iteration_bounds = array<i64: 1, 1>, scalar_prefetch = 0 : i64, scratch_operands = 1 : i64, tpu.core_type = #tpu.core_type<tc>, window_params = [{transform_indices = @transform_0, window_bounds = array<i64: 8, 32>}, {transform_indices = @transform_1, window_bounds = array<i64: 8, 32>}, {transform_indices = @transform_2, window_bounds = array<i64: 32, 1>}, {transform_indices = @transform_3, window_bounds = array<i64: 1>}, {transform_indices = @transform_4, window_bounds = array<i64: 8, 2>}]} {
    %c0_i32 = arith.constant 0 : i32
    %0 = arith.cmpi eq, %arg1, %c0_i32 : i32
    %1 = arith.extui %0 : i1 to i32
    %c0_i32_0 = arith.constant 0 : i32
    %2 = arith.cmpi ne, %1, %c0_i32_0 : i32
    scf.if %2 {
      %cst_16 = arith.constant 0.000000e+00 : f32
      %17 = vector.broadcast %cst_16 : f32 to vector<8x2xf32>
      %c0_17 = arith.constant 0 : index
      %c0_18 = arith.constant 0 : index
      %18 = vector.load %arg7[%c0_17, %c0_18] : memref<8x2xf32, #tpu.memory_space<vmem>>, vector<8x2xf32>
      tpu.vector_store %arg7[%c0_17, %c0_18], %17 {strides = array<i32>} : memref<8x2xf32, #tpu.memory_space<vmem>>, vector<8x2xf32>,
    } else {
    }
    %c0 = arith.constant 0 : index
    %c0_1 = arith.constant 0 : index
    %3 = vector.load %arg4[%c0, %c0_1] : memref<32x1xf32, #tpu.memory_space<vmem>>, vector<32x1xf32>
    %c0_2 = arith.constant 0 : index
    %c0_3 = arith.constant 0 : index
    %4 = vector.load %arg2[%c0_2, %c0_3] : memref<8x32xf32, #tpu.memory_space<vmem>>, vector<8x32xf32>
    %cst = arith.constant dense<0.000000e+00> : vector<8x1xf32>
    %5 = tpu.matmul %4, %3, %cst {dimension_numbers = #tpu.dot_dimension_numbers<[1], [0], [0], [1], [0, 0, 1, 1], [], []>} : vector<8x32xf32>, vector<32x1xf32>, vector<8x1xf32> -> vector<8x1xf32>
    %c0_4 = arith.constant 0 : index
    %c0_5 = arith.constant 0 : index
    %6 = vector.load %arg3[%c0_4, %c0_5] : memref<8x32xf32, #tpu.memory_space<vmem>>, vector<8x32xf32>
    %cst_6 = arith.constant dense<0.000000e+00> : vector<8x1xf32>
    %7 = tpu.matmul %6, %3, %cst_6 {dimension_numbers = #tpu.dot_dimension_numbers<[1], [0], [0], [1], [0, 0, 1, 1], [], []>} : vector<8x32xf32>, vector<32x1xf32>, vector<8x1xf32> -> vector<8x1xf32>
    %c0_7 = arith.constant 0 : index
    %c0_8 = arith.constant 0 : index
    %8 = vector.load %arg7[%c0_7, %c0_8] : memref<8x2xf32, #tpu.memory_space<vmem>>, vector<8x1xf32>
    %9 = arith.addf %8, %5 : vector<8x1xf32>
    %c0_9 = arith.constant 0 : index
    %c0_10 = arith.constant 0 : index
    %10 = vector.load %arg7[%c0_9, %c0_10] : memref<8x2xf32, #tpu.memory_space<vmem>>, vector<8x1xf32>
    tpu.vector_store %arg7[%c0_9, %c0_10], %9 {strides = array<i32>} : memref<8x2xf32, #tpu.memory_space<vmem>>, vector<8x1xf32>,
    %c0_11 = arith.constant 0 : index
    %c1 = arith.constant 1 : index
    %11 = vector.load %arg7[%c0_11, %c1] : memref<8x2xf32, #tpu.memory_space<vmem>>, vector<8x1xf32>
    %12 = arith.addf %11, %7 : vector<8x1xf32>
    %c0_12 = arith.constant 0 : index
    %c1_13 = arith.constant 1 : index
    %13 = vector.load %arg7[%c0_12, %c1_13] : memref<8x2xf32, #tpu.memory_space<vmem>>, vector<8x1xf32>
    tpu.vector_store %arg7[%c0_12, %c1_13], %12 {strides = array<i32>} : memref<8x2xf32, #tpu.memory_space<vmem>>, vector<8x1xf32>,
    %c0_i32_14 = arith.constant 0 : i32
    %14 = arith.cmpi eq, %arg1, %c0_i32_14 : i32
    %15 = arith.extui %14 : i1 to i32
    %c0_i32_15 = arith.constant 0 : i32
    %16 = arith.cmpi ne, %15, %c0_i32_15 : i32
    scf.if %16 {
      %c0_16 = arith.constant 0 : index
      %c0_17 = arith.constant 0 : index
      %17 = vector.load %arg7[%c0_16, %c0_17] : memref<8x2xf32, #tpu.memory_space<vmem>>, vector<8x2xf32>
      %c0_18 = arith.constant 0 : index
      %18 = memref.load %arg5[%c0_18] : memref<1xf32, #tpu.memory_space<smem>>
      %19 = vector.broadcast %18 : f32 to vector<8x2xf32>
      %20 = arith.addf %17, %19 : vector<8x2xf32>
      %c0_19 = arith.constant 0 : index
      %c0_20 = arith.constant 0 : index
      %21 = vector.load %arg6[%c0_19, %c0_20] : memref<8x2xf32, #tpu.memory_space<vmem>>, vector<8x2xf32>
      tpu.vector_store %arg6[%c0_19, %c0_20], %20 {strides = array<i32>} : memref<8x2xf32, #tpu.memory_space<vmem>>, vector<8x2xf32>,
    } else {
    }
    return
  }
  func.func @transform_0(%arg0: i32, %arg1: i32) -> (i32, i32) {
    %c0_i32 = arith.constant 0 : i32
    return %arg0, %arg1 : i32, i32
  }
  func.func @transform_1(%arg0: i32, %arg1: i32) -> (i32, i32) {
    %c0_i32 = arith.constant 0 : i32
    return %arg0, %arg1 : i32, i32
  }
  func.func @transform_2(%arg0: i32, %arg1: i32) -> (i32, i32) {
    %c0_i32 = arith.constant 0 : i32
    %c0_i32_0 = arith.constant 0 : i32
    return %arg1, %c0_i32 : i32, i32
  }
  func.func @transform_3(%arg0: i32, %arg1: i32) -> i32 {
    %c0_i32 = arith.constant 0 : i32
    %c0_i32_0 = arith.constant 0 : i32
    return %c0_i32 : i32
  }
  func.func @transform_4(%arg0: i32, %arg1: i32) -> (i32, i32) {
    %c0_i32 = arith.constant 0 : i32
    %c0_i32_0 = arith.constant 0 : i32
    return %arg0, %c0_i32 : i32, i32
  }
}

</mosaic_0001>

<bundles_post_ra>
// kernel: tpu_custom_call.1
= control target key start
LH: loop header
LB: loop body
LE: loop exit
PB: predicated region body
PF: predicated region fallthrough
CT: control target
= control target key end

     0   :  { %vm22_vm0 = vcmask 15360   ;;  %v252_v0 = vmov 0.0|0.0   ;;  %v253_v4 = vmov 0.0   ;;  %vm254_vm1 = vmmov 0   ;;  %s307_s2 = inlined_call_operand.vmem [shape: f32[32,1], index: 2, kind: input, shape index: {}]   ;;  %s308_s1 = inlined_call_operand.vmem [shape: f32[8,32], index: 1, kind: input, shape index: {}]   ;;  %s309_s0 = inlined_call_operand.vmem [shape: f32[8,32], index: 0, kind: input, shape index: {}]   ;;  %s310_s3 = inlined_call_operand.<no memory space> [shape: f32[1], index: 3, kind: input, shape index: {}]   ;;  %s311_s4 = inlined_call_operand.vmem [shape: f32[8,2], index: 4, kind: output, shape index: {}]  }
   0x1   :  { %242 = vmatprep.subr.bf16.mxu1 %v252_v0  ;;  %v24_v1 = vld [vmem:[%s307_s2] sm:$0xff]  ;;  %v25_v2 = vld [vmem:[%s307_s2 + $0x8] sm:$0xff]  ;;  %v26_v3 = vld [vmem:[%s307_s2 + $0x10] sm:$0xff]  ;;  %23 = vst.msk [vmem:[#allocation2] sm:$0xff] %vm22_vm0, %v253_v4  ;;  %233 = vmatprep.mubr.msk.f32.mxu1 %vm254_vm1, %v253_v4  ;;  %vm29_vm2 = vcmask 261120   ;;  %vm179_vm3 = vcmask 7168   ;;  %v194_v19 = vstv %s310_s3 }
   0x2   :  { %v237_v5 = vpack.c.bf16 %v25_v2, %v24_v1  ;;  %v27_v6 = vld [vmem:[%s307_s2 + $0x18] sm:$0xff]  ;;  %236 = vmatprep.subr.bf16.mxu0 %v252_v0  ;;  %222 = vmatprep.mubr.msk.f32.mxu0 %vm254_vm1, %v253_v4  ;;  %v103_v8 = vld [vmem:[%s308_s1] sm:$0xff]  ;;  %s255_s2 = smov 1   ;;  %vm187_vm4 = vcmask 15368  }
   0x3   :  { %v240_v7 = vpack.c.bf16 %v27_v6, %v26_v3  ;;  %v28_v9 = vld [vmem:[%s309_s0] sm:$0xff] }
   0x4   :  { %244 = vmatpush3.bf16.msra.mxu1 %v237_v5  ;;  %238 = vmatpush3.bf16.msra.mxu0 %v237_v5 }
   0x5   :  { %245 = vmatprep.subr.bf16.mxu1 %v252_v0  ;;  %239 = vmatprep.subr.bf16.mxu0 %v252_v0 }
   0x8   :  { %247 = vmatpush3.bf16.msra.mxu1 %v240_v7  ;;  %241 = vmatpush3.bf16.msra.mxu0 %v240_v7  ;;  %v177_v10 = vld [vmem:[#allocation2] sm:$0xff] }
   0xb   :  { %234 = vmatmul.mubr.msk.f32.vlgmr.msra.gmra.mrb[0].mxu1 %vm29_vm2, %v103_v8  ;;  %223 = vmatmul.mubr.msk.f32.vlgmr.msra.gmra.mrb[0].mxu0 %vm29_vm2, %v28_v9 }
  0xde   :  { %v173_v11 = vpop.f32.mrb[0].mxu1  ;;  %v99_v12 = vpop.f32.mrb[0].mxu0 }
  0xdf   :  { %v235_v13 = vpop.f32.mrb[1].mxu1  ;;  %183 = vrot.lane.b32.xlu0 %v173_v11, %s255_s2  ;;  %v178_v14 = vadd.f32 %v177_v10, %v99_v12  ;;  %v224_v15 = vpop.f32.mrb[1].mxu0 }
  0xe1   :  { %180 = vst.msk [vmem:[#allocation2] sm:$0xff] %vm179_vm3, %v178_v14 }
  0xe8   :  { %v181_v16 = vld [vmem:[#allocation2] sm:$0xff] }
 0x151   :  { %v184_v17 = vpop.permute.xlu0 %183 }
 0x152   :  { %v186_v18 = vadd.f32 %v184_v17, %v181_v16 }
 0x154   :  { %188 = vst.msk [vmem:[#allocation2] sm:$0xff] %vm187_vm4, %v186_v18 }
 0x15b   :  { %v192_v20 = vld [vmem:[#allocation2] sm:$0xff] }
 0x15c   :  { %v195_v21 = vadd.f32 %v194_v19, %v192_v20 }
 0x15e   :  { %197 = vst.msk [vmem:[%s311_s4] sm:$0xff] %vm22_vm0, %v195_v21 }

</bundles_post_ra>
